<compile_context>
chip_gen: v7x
topology: tpu7x:2x2x1
jax: 0.10.0
libtpu: 0.0.40
codegen_flags: <defaults>
</compile_context>

<pallas_src>
import jax
import jax.numpy as jnp
from jax import lax
from jax.experimental import pallas as pl
from jax.experimental.pallas import tpu as pltpu

_MIB = 1024 * 1024


# ---------------------------------------------------------------------------
# Per-generation tuning.
# ---------------------------------------------------------------------------

def _detect_gen():
    try:
        kind = jax.devices()[0].device_kind.lower()
    except Exception:
        kind = ""
    if "v7" in kind:
        return "v7x"
    if "v6" in kind:
        return "v6e"
    if "v5e" in kind or "v5 lite" in kind or "v5lite" in kind:
        return "v5e"
    return "other"


# Fuse thresholds are set near the crossover where the exact-f32 one-hot
# MXU gather (3*V*D MACs/triple, multi-pass f32) stops beating streaming
# pre-gathered rows at that generation's HBM bandwidth.
# TODO(synk): a bf16 hi/lo split of the tables (2 bf16 matmuls per gather,
# ~1e-5 relative error) would cut the MXU cost ~3x and allow roughly 2x
# higher fuse thresholds on v6e/v7x.
_GEN_CONFIG = {
    # v5e: 16 MiB scoped-VMEM default, ~197 TF/s MXU, ~820 GB/s HBM.
    "v5e": dict(stream_budget=10 * _MIB, stream_max_tn=2048,
                fused_budget=10 * _MIB, fused_max_tn=1024,
                fused_nodes=256, fused_rels=256,
                rel_fuse_bytes=512 * 1024,
                vmem_limit=None, min_steps=1),
    # v6e: 32 MiB scoped default, 918 TF/s MXU, ~1.4 TB/s HBM.
    "v6e": dict(stream_budget=22 * _MIB, stream_max_tn=4096,
                fused_budget=22 * _MIB, fused_max_tn=2048,
                fused_nodes=1024, fused_rels=1024,
                rel_fuse_bytes=1 * _MIB,
                vmem_limit=None, min_steps=1),
    # v7x: 64 MiB physical / 32 MiB scoped default, ~3.2 TB/s HBM, 2 TCs.
    "v7x": dict(stream_budget=32 * _MIB, stream_max_tn=8192,
                fused_budget=26 * _MIB, fused_max_tn=2048,
                fused_nodes=1024, fused_rels=1024,
                rel_fuse_bytes=1 * _MIB,
                vmem_limit=44 * _MIB, min_steps=2),
    # Unknown TPU: conservative defaults that fit any scoped-VMEM default.
    "other": dict(stream_budget=8 * _MIB, stream_max_tn=2048,
                  fused_budget=8 * _MIB, fused_max_tn=1024,
                  fused_nodes=512, fused_rels=512,
                  rel_fuse_bytes=512 * 1024,
                  vmem_limit=None, min_steps=1),
}


def _config():
    return _GEN_CONFIG[_detect_gen()]


def _compiler_params(cfg):
    return pltpu.CompilerParams(dimension_semantics=("parallel",),
                                vmem_limit_bytes=cfg["vmem_limit"])


# ---------------------------------------------------------------------------
# Small helpers.
# ---------------------------------------------------------------------------

def _round_up(x, m):
    return ((x + m - 1) // m) * m


def _choose_tile(n, cap, *, min_steps=1):
    """Tile size (multiple of 128) and padded triple count.

    Small batches collapse to a single grid step (no pipeline/step overhead);
    large batches use the largest tile allowed by `cap`.  When `min_steps > 1`
    (v7x), non-trivial batches are forced onto >= min_steps grid steps so the
    'parallel' grid axis can shard across both TensorCores.
    """
    cap = max(128, (cap // 128) * 128)
    if min_steps > 1 and n > 256:
        per_step = _round_up((n + min_steps - 1) // min_steps, 128)
        cap = min(cap, max(128, per_step))
    if n <= cap:
        tn = max(128, _round_up(n, 128))
        return tn, tn
    return cap, _round_up(n, cap)


def _pad_idx(idx, n_pad):
    idx = idx.astype(jnp.int32)
    n = idx.shape[0]
    if n_pad > n:
        idx = jnp.pad(idx, (0, n_pad - n))   # pad with 0 (a valid row id)
    return idx


# ---------------------------------------------------------------------------
# Path 1: fully fused gathers (tables resident in VMEM, one-hot MXU gather).
# ---------------------------------------------------------------------------

def _distmult_fused_kernel(nodes_t_ref, rel_t_ref, sidx_ref, pidx_ref,
                           oidx_ref, out_ref):
    nodes_t = nodes_t_ref[...]                                   # (D, Vn) f32
    rel_t = rel_t_ref[...]                                       # (D, Vr) f32
    vn = nodes_t.shape[1]
    vr = rel_t.shape[1]
    tn = sidx_ref.shape[1]

    # One (Vn, TN) iota shared by the s and o one-hots (JAX does not CSE
    # broadcast_in_dim, so building it once removes ~1/3 of the VPU work in
    # this otherwise DMA-trivial path).
    iota_n = lax.broadcasted_iota(jnp.int32, (vn, tn), 0)
    onehot_s = (iota_n == sidx_ref[...]).astype(jnp.float32)     # (Vn, TN)
    onehot_o = (iota_n == oidx_ref[...]).astype(jnp.float32)     # (Vn, TN)
    iota_r = lax.broadcasted_iota(jnp.int32, (vr, tn), 0)
    onehot_p = (iota_r == pidx_ref[...]).astype(jnp.float32)     # (Vr, TN)

    # Gathers as one-hot matmuls on the otherwise idle MXU.  Mosaic lowers
    # these f32 matmuls without bf16-truncating the table operand (verified
    # against the exact f32 reference in __main__).
    s_t = jnp.dot(nodes_t, onehot_s, preferred_element_type=jnp.float32)
    o_t = jnp.dot(nodes_t, onehot_o, preferred_element_type=jnp.float32)
    p_t = jnp.dot(rel_t, onehot_p, preferred_element_type=jnp.float32)

    prod = s_t * p_t * o_t                                       # (D, TN) VPU
    # Reduce over the sublane (embedding) axis -> lane-dense (1, TN) output.
    out_ref[...] = jnp.sum(prod, axis=0, keepdims=True)


def distmult_scores_fused(nodes, relations, s_idx, p_idx, o_idx, *, cfg=None):
    """DistMult scores with node + relation gathers fused into the kernel."""
    cfg = cfg if cfg is not None else _config()
    num_nodes, d = nodes.shape
    num_rel = relations.shape[0]
    n = s_idx.shape[0]

    # Tile cap from the per-generation VMEM budget.  Counted per step:
    # resident tables (double-buffered), sublane-padded (8, tn) index/output
    # blocks, iota/one-hot intermediates, gathered (D, TN) f32 tiles.
    table_bytes = 2 * (num_nodes + num_rel) * d * 4
    per_tn = (4 * 2 * 8 * 4                    # 3 idx + 1 out block, 2 buffers
              + 16 * num_nodes + 10 * num_rel  # iota + masks + f32 one-hots
              + 32 * d)                        # s_t/o_t/p_t/prod f32 tiles
    cap = (cfg["fused_budget"] - table_bytes) // max(per_tn, 1)
    cap = min(cfg["fused_max_tn"], cap)
    tn, n_pad = _choose_tile(n, cap, min_steps=cfg["min_steps"])

    s_idx2 = _pad_idx(s_idx, n_pad).reshape(1, n_pad)
    p_idx2 = _pad_idx(p_idx, n_pad).reshape(1, n_pad)
    o_idx2 = _pad_idx(o_idx, n_pad).reshape(1, n_pad)

    # One-time table transpose (outside the kernel, negligible vs. triple
    # traffic).  Kept f32 to match the PyTorch reference exactly.
    nodes_t = jnp.asarray(nodes, jnp.float32).T                  # (D, Vn)
    rel_t = jnp.asarray(relations, jnp.float32).T                # (D, Vr)

    table_spec_n = pl.BlockSpec((d, num_nodes), lambda i: (0, 0))
    table_spec_r = pl.BlockSpec((d, num_rel), lambda i: (0, 0))
    idx_spec = pl.BlockSpec((1, tn), lambda i: (0, i))
    # TODO(synk): pipeline_mode=pl.Buffered(1) on the resident-table specs
    # would halve their VMEM footprint (constant index_map); left on default
    # double-buffering (already counted in table_bytes) for portability.

    out = pl.pallas_call(
        _distmult_fused_kernel,
        out_shape=jax.ShapeDtypeStruct((1, n_pad), jnp.float32),
        grid_spec=pltpu.PrefetchScalarGridSpec(
            num_scalar_prefetch=0,
            grid=(n_pad // tn,),
            in_specs=[table_spec_n, table_spec_r,
                      idx_spec, idx_spec, idx_spec],
            out_specs=pl.BlockSpec((1, tn), lambda i: (0, i)),
        ),
        compiler_params=_compiler_params(cfg),
    )(nodes_t, rel_t, s_idx2, p_idx2, o_idx2)
    return out[0, :n]


# ---------------------------------------------------------------------------
# Path 2: relation gather fused, node rows pre-gathered by XLA.
# ---------------------------------------------------------------------------

def _distmult_relfused_kernel(rel_ref, pidx_ref, s_ref, o_ref, out_ref):
    num_rel = rel_ref.shape[0]
    tn = s_ref.shape[0]
    iota = lax.broadcasted_iota(jnp.int32, (tn, num_rel), 1)       # (TN, R)
    onehot = (iota == pidx_ref[...]).astype(jnp.float32)           # (TN, R)
    p = jnp.dot(onehot, rel_ref[...],
                preferred_element_type=jnp.float32)                # (TN, D)
    prod = s_ref[...].astype(jnp.float32) * p * o_ref[...].astype(jnp.float32)
    # Lane-dense (1, TN) score block (unmasked vst) instead of a (TN, 1)
    # column that would force masked partial stores.
    out_ref[...] = jnp.sum(prod, axis=-1).reshape(1, tn)


def distmult_scores_relfused(nodes, relations, s_idx, p_idx, o_idx, *,
                             stream_dtype=jnp.float32, cfg=None):
    cfg = cfg if cfg is not None else _config()
    num_rel, d = relations.shape
    n = s_idx.shape[0]
    esz = jnp.dtype(stream_dtype).itemsize

    # VMEM per step: 2 streamed (tn, d) inputs x 2 buffers, the resident rel
    # table (x2 buffers), the lane-padded (tn, 128) p-index block, the
    # sublane-padded (8, tn) output block, and one-hot / gathered-p temps.
    rel_bytes = 2 * num_rel * d * 4
    per_tn = (2 * 2 * d * esz                 # s, o streamed rows
              + 2 * 128 * 4                   # p-index block, lane-padded
              + 2 * 8 * 4                     # output block, sublane-padded
              + 10 * num_rel                  # iota + mask + f32 one-hot
              + 20 * d)                       # p, casts, product temps (f32)
    cap = (cfg["stream_budget"] - rel_bytes) // max(per_tn, 1)
    cap = min(cfg["stream_max_tn"], cap)
    tn, n_pad = _choose_tile(n, cap, min_steps=cfg["min_steps"])

    s_idx2 = _pad_idx(s_idx, n_pad)
    o_idx2 = _pad_idx(o_idx, n_pad)
    p_idx2 = _pad_idx(p_idx, n_pad).reshape(n_pad, 1)

    # s/o rows gathered by XLA; stream_dtype=jnp.bfloat16 halves streamed HBM
    # bytes (~2x on this mem-bound path) at a ~4e-3 relative-precision cost vs
    # the exact f32 PyTorch reference; default keeps f32.
    # TODO(synk): a manual DMA row gather (memory_space=pl.ANY +
    # make_async_copy) would also remove the (N, D) s/o HBM round trip.
    s = jnp.asarray(nodes, stream_dtype)[s_idx2, :]
    o = jnp.asarray(nodes, stream_dtype)[o_idx2, :]
    rel = jnp.asarray(relations, jnp.float32)

    out = pl.pallas_call(
        _distmult_relfused_kernel,
        out_shape=jax.ShapeDtypeStruct((1, n_pad), jnp.float32),
        grid_spec=pltpu.PrefetchScalarGridSpec(
            num_scalar_prefetch=0,
            grid=(n_pad // tn,),
            in_specs=[
                pl.BlockSpec((num_rel, d), lambda i: (0, 0)),   # resident table
                pl.BlockSpec((tn, 1), lambda i: (i, 0)),        # p indices
                pl.BlockSpec((tn, d), lambda i: (i, 0)),        # s rows
                pl.BlockSpec((tn, d), lambda i: (i, 0)),        # o rows
            ],
            out_specs=pl.BlockSpec((1, tn), lambda i: (0, i)),
        ),
        compiler_params=_compiler_params(cfg),
    )(rel, p_idx2, s, o)
    return out[0, :n]


# ---------------------------------------------------------------------------
# Path 3: plain pre-gathered multiply-reduce (everything large).
# ---------------------------------------------------------------------------

def _distmult_gathered_kernel(s_ref, p_ref, o_ref, out_ref):
    tn = s_ref.shape[0]
    prod = (s_ref[...].astype(jnp.float32) * p_ref[...].astype(jnp.float32)
            * o_ref[...].astype(jnp.float32))
    # Lane-dense (1, TN) output block.
    out_ref[...] = jnp.sum(prod, axis=-1).reshape(1, tn)


def distmult_scores_pregathered(nodes, relations, s_idx, p_idx, o_idx, *,
                                stream_dtype=jnp.float32, cfg=None):
    cfg = cfg if cfg is not None else _config()
    n = s_idx.shape[0]
    d = nodes.shape[1]
    esz = jnp.dtype(stream_dtype).itemsize

    # 3 streamed inputs x 2 pipeline buffers x (tn, d), plus the sublane-padded
    # output block and f32 cast/product temporaries.
    per_tn = (3 * 2 * d * esz
              + 2 * 8 * 4
              + 20 * d)
    cap = cfg["stream_budget"] // max(per_tn, 1)
    cap = min(cfg["stream_max_tn"], cap)
    tn, n_pad = _choose_tile(n, cap, min_steps=cfg["min_steps"])

    s_idx2 = _pad_idx(s_idx, n_pad)
    p_idx2 = _pad_idx(p_idx, n_pad)
    o_idx2 = _pad_idx(o_idx, n_pad)
    # stream_dtype=jnp.bfloat16 halves streamed HBM bytes (~2x end-to-end on
    # this mem-bound path) with a documented ~4e-3 precision tradeoff.
    s = jnp.asarray(nodes, stream_dtype)[s_idx2, :]
    p = jnp.asarray(relations, stream_dtype)[p_idx2, :]
    o = jnp.asarray(nodes, stream_dtype)[o_idx2, :]

    out = pl.pallas_call(
        _distmult_gathered_kernel,
        out_shape=jax.ShapeDtypeStruct((1, n_pad), jnp.float32),
        grid_spec=pltpu.PrefetchScalarGridSpec(
            num_scalar_prefetch=0,
            grid=(n_pad // tn,),
            in_specs=[pl.BlockSpec((tn, d), lambda i: (i, 0))] * 3,
            out_specs=pl.BlockSpec((1, tn), lambda i: (0, i)),
        ),
        compiler_params=_compiler_params(cfg),
    )(s, p, o)
    return out[0, :n]


# ---------------------------------------------------------------------------
# Module wrapper.
# ---------------------------------------------------------------------------

class DistMultJax:
    """JAX/Pallas port of the PyTorch DistMult decoder (default config:
    w_init='standard-normal', w_gain=False, b_init=None -> no bias terms)."""

    def __init__(self, num_rel, embed_dim, key, *, stream_dtype=jnp.float32):
        self.relations = jax.random.normal(key, (num_rel, embed_dim),
                                           dtype=jnp.float32)
        self.stream_dtype = stream_dtype
        # TODO(synk): optional sbias/pbias/obias path (b_init != None) not
        # implemented; the module's default configuration disables it.

    def __call__(self, triples, nodes):
        s_idx, p_idx, o_idx = triples[:, 0], triples[:, 1], triples[:, 2]
        cfg = _config()
        num_nodes, d = nodes.shape
        num_rel = self.relations.shape[0]
        if num_nodes <= cfg["fused_nodes"] and num_rel <= cfg["fused_rels"]:
            return distmult_scores_fused(nodes, self.relations,
                                         s_idx, p_idx, o_idx, cfg=cfg)
        # Fuse the (small) relation gather whenever the table fits a couple of
        # MiB of VMEM -- removes one of the three streamed (N, D) arrays.
        if num_rel * d * 4 <= cfg["rel_fuse_bytes"]:
            return distmult_scores_relfused(nodes, self.relations,
                                            s_idx, p_idx, o_idx,
                                            stream_dtype=self.stream_dtype,
                                            cfg=cfg)
        return distmult_scores_pregathered(nodes, self.relations,
                                           s_idx, p_idx, o_idx,
                                           stream_dtype=self.stream_dtype,
                                           cfg=cfg)


if __name__ == "__main__":
    key = jax.random.PRNGKey(0)
    k_rel, k_nodes, k_s, k_p, k_o = jax.random.split(key, 5)

    num_nodes = 64
    num_rel = 8
    embed_dim = 128        # "outdim"
    num_triples = 200      # deliberately not a multiple of the tile size

    model = DistMultJax(num_rel, embed_dim, k_rel)

    nodes = jax.random.normal(k_nodes, (num_nodes, embed_dim), dtype=jnp.float32)
    s_idx = jax.random.randint(k_s, (num_triples,), 0, num_nodes, dtype=jnp.int32)
    p_idx = jax.random.randint(k_p, (num_triples,), 0, num_rel, dtype=jnp.int32)
    o_idx = jax.random.randint(k_o, (num_triples,), 0, num_nodes, dtype=jnp.int32)
    triples = jnp.stack([s_idx, p_idx, o_idx], axis=1)   # (N, 3) int32

    # Path 1 (fully fused) is what the module picks for these table sizes.
    scores = jax.block_until_ready(model(triples, nodes))
    # Paths 2 and 3 exercised explicitly for compile/correctness coverage.
    scores_rf = jax.block_until_ready(
        distmult_scores_relfused(nodes, model.relations, s_idx, p_idx, o_idx))
    scores_pg = jax.block_until_ready(
        distmult_scores_pregathered(nodes, model.relations, s_idx, p_idx, o_idx))

    # Pure-JAX reference (exact f32).  A bf16-truncated one-hot gather would
    # show up here as ~5e-2 absolute error, far outside the tolerance, so this
    # also verifies the Mosaic f32 matmul lowering is not reducing precision.
    ref = jnp.sum(nodes[s_idx] * model.relations[p_idx] * nodes[o_idx], axis=-1)

    assert scores.shape == (num_triples,)
    assert jnp.allclose(scores, ref, rtol=1e-4, atol=1e-4)
    assert jnp.allclose(scores_rf, ref, rtol=1e-4, atol=1e-4)
    assert jnp.allclose(scores_pg, ref, rtol=1e-4, atol=1e-4)

    print("KERNEL_OK")
</pallas_src>

<mosaic_0001>
module attributes {stable_mosaic.version = 11 : i64} {
  func.func @_distmult_fused_kernel(%arg0: i32, %arg1: memref<128x64xf32, #tpu.memory_space<vmem>>, %arg2: memref<128x8xf32, #tpu.memory_space<vmem>>, %arg3: memref<1x256xi32, #tpu.memory_space<vmem>>, %arg4: memref<1x256xi32, #tpu.memory_space<vmem>>, %arg5: memref<1x256xi32, #tpu.memory_space<vmem>>, %arg6: memref<1x256xf32, #tpu.memory_space<vmem>>) attributes {dimension_semantics = [#tpu.dimension_semantics<parallel>], iteration_bounds = array<i64: 1>, scalar_prefetch = 0 : i64, scratch_operands = 0 : i64, tpu.core_type = #tpu.core_type<tc>, window_params = [{pipeline_mode = #tpu.pipeline_mode<synchronous>, transform_indices = @transform_0, window_bounds = array<i64: 128, 64>}, {pipeline_mode = #tpu.pipeline_mode<synchronous>, transform_indices = @transform_1, window_bounds = array<i64: 128, 8>}, {transform_indices = @transform_2, window_bounds = array<i64: 1, 256>}, {transform_indices = @transform_3, window_bounds = array<i64: 1, 256>}, {transform_indices = @transform_4, window_bounds = array<i64: 1, 256>}, {transform_indices = @transform_5, window_bounds = array<i64: 1, 256>}]} {
    %c0 = arith.constant 0 : index
    %c0_0 = arith.constant 0 : index
    %0 = vector.load %arg1[%c0, %c0_0] : memref<128x64xf32, #tpu.memory_space<vmem>>, vector<128x64xf32>
    %c0_1 = arith.constant 0 : index
    %c0_2 = arith.constant 0 : index
    %1 = vector.load %arg2[%c0_1, %c0_2] : memref<128x8xf32, #tpu.memory_space<vmem>>, vector<128x8xf32>
    %2 = tpu.iota {dimensions = array<i32: 0>} : vector<64x256xi32>
    %c0_3 = arith.constant 0 : index
    %c0_4 = arith.constant 0 : index
    %3 = vector.load %arg3[%c0_3, %c0_4] : memref<1x256xi32, #tpu.memory_space<vmem>>, vector<1x256xi32>
    %4 = vector.broadcast %3 : vector<1x256xi32> to vector<64x256xi32>
    %5 = arith.cmpi eq, %2, %4 : vector<64x256xi32>
    %6 = arith.extui %5 : vector<64x256xi1> to vector<64x256xi32>
    %7 = arith.sitofp %6 : vector<64x256xi32> to vector<64x256xf32>
    %c0_5 = arith.constant 0 : index
    %c0_6 = arith.constant 0 : index
    %8 = vector.load %arg5[%c0_5, %c0_6] : memref<1x256xi32, #tpu.memory_space<vmem>>, vector<1x256xi32>
    %9 = vector.broadcast %8 : vector<1x256xi32> to vector<64x256xi32>
    %10 = arith.cmpi eq, %2, %9 : vector<64x256xi32>
    %11 = arith.extui %10 : vector<64x256xi1> to vector<64x256xi32>
    %12 = arith.sitofp %11 : vector<64x256xi32> to vector<64x256xf32>
    %13 = tpu.iota {dimensions = array<i32: 0>} : vector<8x256xi32>
    %c0_7 = arith.constant 0 : index
    %c0_8 = arith.constant 0 : index
    %14 = vector.load %arg4[%c0_7, %c0_8] : memref<1x256xi32, #tpu.memory_space<vmem>>, vector<1x256xi32>
    %15 = vector.broadcast %14 : vector<1x256xi32> to vector<8x256xi32>
    %16 = arith.cmpi eq, %13, %15 : vector<8x256xi32>
    %17 = arith.extui %16 : vector<8x256xi1> to vector<8x256xi32>
    %18 = arith.sitofp %17 : vector<8x256xi32> to vector<8x256xf32>
    %cst = arith.constant dense<0.000000e+00> : vector<128x256xf32>
    %19 = tpu.matmul %0, %7, %cst {dimension_numbers = #tpu.dot_dimension_numbers<[1], [0], [0], [1], [0, 0, 1, 1], [], []>} : vector<128x64xf32>, vector<64x256xf32>, vector<128x256xf32> -> vector<128x256xf32>
    %cst_9 = arith.constant dense<0.000000e+00> : vector<128x256xf32>
    %20 = tpu.matmul %0, %12, %cst_9 {dimension_numbers = #tpu.dot_dimension_numbers<[1], [0], [0], [1], [0, 0, 1, 1], [], []>} : vector<128x64xf32>, vector<64x256xf32>, vector<128x256xf32> -> vector<128x256xf32>
    %cst_10 = arith.constant dense<0.000000e+00> : vector<128x256xf32>
    %21 = tpu.matmul %1, %18, %cst_10 {dimension_numbers = #tpu.dot_dimension_numbers<[1], [0], [0], [1], [0, 0, 1, 1], [], []>} : vector<128x8xf32>, vector<8x256xf32>, vector<128x256xf32> -> vector<128x256xf32>
    %22 = arith.mulf %19, %21 : vector<128x256xf32>
    %23 = arith.mulf %22, %20 : vector<128x256xf32>
    %cst_11 = arith.constant dense<0.000000e+00> : vector<256xf32>
    %24 = vector.multi_reduction <add>, %23, %cst_11 [0] : vector<128x256xf32> to vector<256xf32>
    %25 = vector.shape_cast %24 : vector<256xf32> to vector<1x256xf32>
    %c0_12 = arith.constant 0 : index
    %c0_13 = arith.constant 0 : index
    %26 = vector.load %arg6[%c0_12, %c0_13] : memref<1x256xf32, #tpu.memory_space<vmem>>, vector<1x256xf32>
    tpu.vector_store %arg6[%c0_12, %c0_13], %25 {strides = array<i32>} : memref<1x256xf32, #tpu.memory_space<vmem>>, vector<1x256xf32>,
    return
  }
  func.func @transform_0(%arg0: i32) -> (i32, i32) {
    %c0_i32 = arith.constant 0 : i32
    %c0_i32_0 = arith.constant 0 : i32
    %c0_i32_1 = arith.constant 0 : i32
    return %c0_i32, %c0_i32_0 : i32, i32
  }
  func.func @transform_1(%arg0: i32) -> (i32, i32) {
    %c0_i32 = arith.constant 0 : i32
    %c0_i32_0 = arith.constant 0 : i32
    %c0_i32_1 = arith.constant 0 : i32
    return %c0_i32, %c0_i32_0 : i32, i32
  }
  func.func @transform_2(%arg0: i32) -> (i32, i32) {
    %c0_i32 = arith.constant 0 : i32
    %c0_i32_0 = arith.constant 0 : i32
    return %c0_i32, %arg0 : i32, i32
  }
  func.func @transform_3(%arg0: i32) -> (i32, i32) {
    %c0_i32 = arith.constant 0 : i32
    %c0_i32_0 = arith.constant 0 : i32
    return %c0_i32, %arg0 : i32, i32
  }
  func.func @transform_4(%arg0: i32) -> (i32, i32) {
    %c0_i32 = arith.constant 0 : i32
    %c0_i32_0 = arith.constant 0 : i32
    return %c0_i32, %arg0 : i32, i32
  }
  func.func @transform_5(%arg0: i32) -> (i32, i32) {
    %c0_i32 = arith.constant 0 : i32
    %c0_i32_0 = arith.constant 0 : i32
    return %c0_i32, %arg0 : i32, i32
  }
}

</mosaic_0001>

<bundles_post_ra>
// kernel: tpu_custom_call.1
= control target key start
LH: loop header
LB: loop body
LE: loop exit
PB: predicated region body
PF: predicated region fallthrough
CT: control target
= control target key end

     0   :  { %v53_v0 = vlaneseq  ;;  %v1100_v1 = vmov 0.0   ;;  %v1101_v13 = vmov 1.0|1.0   ;;  %v1102_v24 = vmov 1.0   ;;  %s1564_s0 = inlined_call_operand.vmem [shape: f32[128,64], index: 0, kind: input, shape index: {}]   ;;  %s1565_s1 = inlined_call_operand.vmem [shape: f32[128,8], index: 1, kind: input, shape index: {}]   ;;  %s1566_s2 = inlined_call_operand.vmem [shape: s32[1,256], index: 2, kind: input, shape index: {}]   ;;  %s1567_s3 = inlined_call_operand.vmem [shape: s32[1,256], index: 3, kind: input, shape index: {}]   ;;  %s1568_s4 = inlined_call_operand.vmem [shape: s32[1,256], index: 4, kind: input, shape index: {}]   ;;  %s1569_s5 = inlined_call_operand.hbm [shape: f32[1,256], index: 5, kind: output, shape index: {}]  }
   0x1   :  { %304 = vmatprep.mubr.f32.mxu0 %v1100_v1  ;;  %352 = vmatprep.mubr.f32.mxu1 %v1100_v1  ;;  %v62_v3 = vld [vmem:[%s1566_s2] sm:$0x3] }
   0x2   :  { %v1138_v2 = vshrl.u32 %v53_v0, 7  ;;  %v119_v16 = vld [vmem:[%s1568_s4] sm:$0x3] }
   0x3   :  { %v176_v17 = vld [vmem:[%s1567_s3] sm:$0x3] }
   0x4   :  { %v1144_v4 = vadd.s32 8, %v1138_v2  ;;  %v69_v5 = vsub.s32 1, %v1138_v2  ;;  %v1148_v6 = vsub.s32 0, %v1138_v2  ;;  %v1151_v7 = vadd.s32 16, %v1138_v2  ;;  %v1227_v22 = vld [vmem:[%s1564_s0] sm:$0xff] }
   0x5   :  { %v1154_v8 = vadd.s32 24, %v1138_v2  ;;  %v1158_v11 = vadd.s32 32, %v1138_v2  ;;  %v1161_v12 = vadd.s32 40, %v1138_v2  ;;  %v1176_v14 = vadd.s32 48, %v1138_v2  ;;  %v1232_v23 = vld [vmem:[%s1564_s0 + $0x40] sm:$0xff] }
   0x6   :  { %v70_v9 = vrot.slane %v62_v3, %v69_v5  ;;  %v66_v10 = vrot.slane %v62_v3, %v1148_v6  ;;  %v1179_v15 = vadd.s32 56, %v1138_v2  ;;  %v1197_v18 = vrot.slane %v119_v16, %v69_v5 }
   0x7   :  { %v184_v19 = vrot.slane %v176_v17, %v69_v5  ;;  %v1206_v20 = vrot.slane %v119_v16, %v1148_v6  ;;  %v180_v21 = vrot.slane %v176_v17, %v1148_v6 }
   0x8   :  { %vm72_vm0 = vcmp.eq.s32.totalorder %v1138_v2, %v70_v9  ;;  %vm74_vm1 = vcmp.eq.s32.totalorder %v1144_v4, %v70_v9  ;;  %vm71_vm2 = vcmp.eq.s32.totalorder %v1138_v2, %v66_v10  ;;  %vm73_vm3 = vcmp.eq.s32.totalorder %v1144_v4, %v66_v10 }
   0x9   :  { %vm1031_vm4 = vmpackc.low %vm74_vm1, %vm72_vm0  ;;  %vm76_vm5 = vcmp.eq.s32.totalorder %v1151_v7, %v70_v9  ;;  %vm78_vm6 = vcmp.eq.s32.totalorder %v1154_v8, %v70_v9  ;;  %vm75_vm7 = vcmp.eq.s32.totalorder %v1151_v7, %v66_v10  ;;  %vm77_vm8 = vcmp.eq.s32.totalorder %v1154_v8, %v66_v10 }
   0xa   :  { %1032 = vmatprep.subr.msk.bf16.mxu0 %vm1031_vm4, %v1101_v13  ;;  %vm1033_vm9 = vmpackc.low %vm73_vm3, %vm71_vm2  ;;  %1063 = vmatprep.subr.msk.bf16.mxu1 %vm1031_vm4, %v1101_v13  ;;  %vm80_vm10 = vcmp.eq.s32.totalorder %v1158_v11, %v70_v9  ;;  %vm82_vm11 = vcmp.eq.s32.totalorder %v1161_v12, %v70_v9  ;;  %vm79_vm15 = vcmp.eq.s32.totalorder %v1158_v11, %v66_v10 }
   0xb   :  { %1034 = vmatpush1.bf16.msk.msra.mxu0 %vm1033_vm9, %v1101_v13  ;;  %1067 = vmatpush1.bf16.msk.msra.mxu1 %vm1033_vm9, %v1101_v13  ;;  %vm1035_vm12 = vmpackc.low %vm78_vm6, %vm76_vm5  ;;  %vm81_vm0 = vcmp.eq.s32.totalorder %v1161_v12, %v66_v10  ;;  %vm84_vm1 = vcmp.eq.s32.totalorder %v1176_v14, %v70_v9  ;;  %vm86_vm2 = vcmp.eq.s32.totalorder %v1179_v15, %v70_v9 }
   0xc   :  { %1036 = vmatprep.subr.msk.bf16.mxu0 %vm1035_vm12, %v1101_v13  ;;  %vm1037_vm13 = vmpackc.low %vm77_vm8, %vm75_vm7  ;;  %1064 = vmatprep.subr.msk.bf16.mxu1 %vm1035_vm12, %v1101_v13  ;;  %vm83_vm5 = vcmp.eq.s32.totalorder %v1176_v14, %v66_v10  ;;  %vm85_vm6 = vcmp.eq.s32.totalorder %v1179_v15, %v66_v10  ;;  %vm129_vm7 = vcmp.eq.s32.totalorder %v1138_v2, %v1197_v18 }
   0xd   :  { %vm1039_vm14 = vmpackc.low %vm82_vm11, %vm80_vm10  ;;  %vm131_vm8 = vcmp.eq.s32.totalorder %v1144_v4, %v1197_v18  ;;  %vm186_vm10 = vcmp.eq.s32.totalorder %v1138_v2, %v184_v19  ;;  %vm128_vm12 = vcmp.eq.s32.totalorder %v1138_v2, %v1206_v20 }
   0xe   :  { %vm1041_vm3 = vmpackc.low %vm81_vm0, %vm79_vm15  ;;  %vm133_vm15 = vcmp.eq.s32.totalorder %v1151_v7, %v1197_v18  ;;  %vm135_vm0 = vcmp.eq.s32.totalorder %v1154_v8, %v1197_v18 }
   0xf   :  { %1038 = vmatpush1.bf16.msk.msra.mxu0 %vm1037_vm13, %v1101_v13  ;;  %1068 = vmatpush1.bf16.msk.msra.mxu1 %vm1037_vm13, %v1101_v13  ;;  %vm1043_vm4 = vmpackc.low %vm86_vm2, %vm84_vm1  ;;  %vm130_vm13 = vcmp.eq.s32.totalorder %v1144_v4, %v1206_v20  ;;  %vm185_vm1 = vcmp.eq.s32.totalorder %v1138_v2, %v180_v21 }
  0x10   :  { %1040 = vmatprep.subr.msk.bf16.mxu0 %vm1039_vm14, %v1101_v13  ;;  %1065 = vmatprep.subr.msk.bf16.mxu1 %vm1039_vm14, %v1101_v13  ;;  %vm1045_vm9 = vmpackc.low %vm85_vm6, %vm83_vm5  ;;  %vm191_vm14 = vcmask 523264  }
  0x11   :  { %vm1047_vm11 = vmpackc.low %vm131_vm8, %vm129_vm7 }
  0x12   :  { %vm1049_vm2 = vmpackc.low %vm130_vm13, %vm128_vm12 }
  0x13   :  { %1042 = vmatpush1.bf16.msk.msra.mxu0 %vm1041_vm3, %v1101_v13  ;;  %1069 = vmatpush1.bf16.msk.msra.mxu1 %vm1041_vm3, %v1101_v13 }
  0x14   :  { %1044 = vmatprep.subr.msk.bf16.mxu0 %vm1043_vm4, %v1101_v13  ;;  %1066 = vmatprep.subr.msk.bf16.mxu1 %vm1043_vm4, %v1101_v13 }
  0x17   :  { %1046 = vmatpush1.bf16.msk.msra.mxu0 %vm1045_vm9, %v1101_v13  ;;  %1070 = vmatpush1.bf16.msk.msra.mxu1 %vm1045_vm9, %v1101_v13 }
  0x18   :  { %1013 = vmatprep.subr.msk.mxu0 %vm186_vm10, %v1102_v24  ;;  %1048 = vmatprep.subr.msk.bf16.mxu1 %vm1047_vm11, %v1101_v13 }
  0x19   :  { %10 = vsyncpa [#allocation3], 0  ;;  %vm132_vm4 = vcmp.eq.s32.totalorder %v1151_v7, %v1206_v20  ;;  %vm134_vm5 = vcmp.eq.s32.totalorder %v1154_v8, %v1206_v20  ;;  %v1252_v25 = vld [vmem:[%s1564_s0 + $0x8] sm:$0xff]  ;;  %vm137_vm6 = vcmp.eq.s32.totalorder %v1158_v11, %v1197_v18  ;;  %vm139_vm7 = vcmp.eq.s32.totalorder %v1161_v12, %v1197_v18  ;;  %v23_v27 = vld [vmem:[%s1564_s0 + $0x10] sm:$0xff] }
  0x1a   :  { %965 = vmatmul.mubr.msk.f32.vlgmr.msra.gmra.mrb[0].mxu0 %vm191_vm14, %v1227_v22  ;;  %973 = vmatmul.mubr.msk.f32.vlgmr.msra.gmra.mrb[0].mxu1 %vm191_vm14, %v1232_v23  ;;  %vm1051_vm3 = vmpackc.low %vm135_vm0, %vm133_vm15  ;;  %v1257_v26 = vld [vmem:[%s1564_s0 + $0x48] sm:$0xff]  ;;  %vm136_vm10 = vcmp.eq.s32.totalorder %v1158_v11, %v1206_v20  ;;  %vm138_vm11 = vcmp.eq.s32.totalorder %v1161_v12, %v1206_v20  ;;  %v1282_v28 = vld [vmem:[%s1564_s0 + $0x50] sm:$0xff]  ;;  %vm141_vm12 = vcmp.eq.s32.totalorder %v1176_v14, %v1197_v18 }
  0x1b   :  { %1014 = vmatpush1.msk.msra.mxu0 %vm185_vm1, %v1102_v24  ;;  %310 = vmatprep.mubr.f32.mxu0 %v1100_v1  ;;  %vm1053_vm8 = vmpackc.low %vm134_vm5, %vm132_vm4  ;;  %vm143_vm13 = vcmp.eq.s32.totalorder %v1179_v15, %v1197_v18  ;;  %vm140_vm1 = vcmp.eq.s32.totalorder %v1176_v14, %v1206_v20  ;;  %v24_v29 = vld [vmem:[%s1564_s0 + $0x18] sm:$0xff]  ;;  %v25_v31 = vld [vmem:[%s1564_s0 + $0x20] sm:$0xff]  ;;  %vm562_vm4 = vcmask 64512  }
  0x1c   :  { %1050 = vmatpush1.bf16.msk.msra.mxu1 %vm1049_vm2, %v1101_v13  ;;  %358 = vmatprep.mubr.f32.mxu1 %v1100_v1  ;;  %vm1055_vm9 = vmpackc.low %vm139_vm7, %vm137_vm6  ;;  %vm142_vm2 = vcmp.eq.s32.totalorder %v1179_v15, %v1206_v20  ;;  %v1305_v30 = vld [vmem:[%s1564_s0 + $0x58] sm:$0xff]  ;;  %v1320_v32 = vld [vmem:[%s1564_s0 + $0x60] sm:$0xff] }
  0x1d   :  { %1052 = vmatprep.subr.msk.bf16.mxu1 %vm1051_vm3, %v1101_v13  ;;  %vm1057_vm15 = vmpackc.low %vm138_vm11, %vm136_vm10  ;;  %v26_v33 = vld [vmem:[%s1564_s0 + $0x28] sm:$0xff]  ;;  %v27_v35 = vld [vmem:[%s1564_s0 + $0x30] sm:$0xff] }
  0x1e   :  { %966 = vmatmul.mubr.msk.f32.gmra.mrb[2].mxu0 %vm191_vm14, %v1252_v25  ;;  %974 = vmatmul.mubr.msk.f32.gmra.mrb[2].mxu1 %vm191_vm14, %v1257_v26  ;;  %vm1059_vm0 = vmpackc.low %vm143_vm13, %vm141_vm12  ;;  %v1334_v34 = vld [vmem:[%s1564_s0 + $0x68] sm:$0xff]  ;;  %v1347_v36 = vld [vmem:[%s1564_s0 + $0x70] sm:$0xff] }
  0x1f   :  { %316 = vmatprep.mubr.f32.mxu0 %v1100_v1  ;;  %364 = vmatprep.mubr.f32.mxu1 %v1100_v1  ;;  %vm1061_vm3 = vmpackc.low %vm142_vm2, %vm140_vm1  ;;  %v28_v37 = vld [vmem:[%s1564_s0 + $0x38] sm:$0xff]  ;;  %v37_v39 = vld [vmem:[%s1565_s1] sm:$0xff] }
  0x20   :  { %1054 = vmatpush1.bf16.msk.msra.mxu1 %vm1053_vm8, %v1101_v13  ;;  %v1360_v38 = vld [vmem:[%s1564_s0 + $0x78] sm:$0xff]  ;;  %v38_v40 = vld [vmem:[%s1565_s1 + $0x8] sm:$0xff]  ;;  %v39_v41 = vld [vmem:[%s1565_s1 + $0x10] sm:$0xff] }
  0x21   :  { %1056 = vmatprep.subr.msk.bf16.mxu1 %vm1055_vm9, %v1101_v13  ;;  %v40_v42 = vld [vmem:[%s1565_s1 + $0x18] sm:$0xff]  ;;  %v41_v43 = vld [vmem:[%s1565_s1 + $0x20] sm:$0xff]  ;;  %v42_v44 = vld [vmem:[%s1565_s1 + $0x28] sm:$0xff] }
  0x22   :  { %967 = vmatmul.mubr.msk.f32.gmra.mrb[4].mxu0 %vm191_vm14, %v23_v27  ;;  %975 = vmatmul.mubr.msk.f32.gmra.mrb[4].mxu1 %vm191_vm14, %v1282_v28  ;;  %v43_v45 = vld [vmem:[%s1565_s1 + $0x30] sm:$0xff]  ;;  %v44_v46 = vld [vmem:[%s1565_s1 + $0x38] sm:$0xff]  ;;  %v45_v47 = vld [vmem:[%s1565_s1 + $0x40] sm:$0xff] }
  0x23   :  { %322 = vmatprep.mubr.f32.mxu0 %v1100_v1  ;;  %370 = vmatprep.mubr.f32.mxu1 %v1100_v1  ;;  %v46_v48 = vld [vmem:[%s1565_s1 + $0x48] sm:$0xff]  ;;  %v47_v49 = vld [vmem:[%s1565_s1 + $0x50] sm:$0xff]  ;;  %v48_v50 = vld [vmem:[%s1565_s1 + $0x58] sm:$0xff] }
  0x24   :  { %1058 = vmatpush1.bf16.msk.msra.mxu1 %vm1057_vm15, %v1101_v13  ;;  %v49_v51 = vld [vmem:[%s1565_s1 + $0x60] sm:$0xff]  ;;  %v50_v52 = vld [vmem:[%s1565_s1 + $0x68] sm:$0xff]  ;;  %v51_v53 = vld [vmem:[%s1565_s1 + $0x70] sm:$0xff] }
  0x25   :  { %1060 = vmatprep.subr.msk.bf16.mxu1 %vm1059_vm0, %v1101_v13  ;;  %v52_v54 = vld [vmem:[%s1565_s1 + $0x78] sm:$0xff]  ;;  %s1104_s1 = smov [#allocation2]  }
  0x26   :  { %968 = vmatmul.mubr.msk.f32.gmra.mrb[6].mxu0 %vm191_vm14, %v24_v29  ;;  %976 = vmatmul.mubr.msk.f32.gmra.mrb[6].mxu1 %vm191_vm14, %v1305_v30  ;;  %s907_s27 = sshll.u32 %s1104_s1, 4  ;;  %s908_s27 = int_to_ptr.vmem [resolvable:$true] %s907_s27 }
  0x27   :  { %328 = vmatprep.mubr.f32.mxu0 %v1100_v1  ;;  %376 = vmatprep.mubr.f32.mxu1 %v1100_v1  ;;  %s1076_s28 = scalar_lea.vmem %s908_s27, 32  ;;  %p1081_p1 = scmp.lt.s32.totalorder %s908_s27, %s908_s27 }
  0x28   :  { %1062 = vmatpush1.bf16.msk.msra.mxu1 %vm1061_vm3, %v1101_v13  ;;  %p1077_p0 = scmp.ne.s32.totalorder %s908_s27, %s1076_s28  ;;  %p1082_p2 = scmp.lt.s32.totalorder %s1076_s28, %s1076_s28 }
  0x2a   :  { %969 = vmatmul.mubr.msk.f32.gmra.mrb[8].mxu0 %vm191_vm14, %v25_v31  ;;  %977 = vmatmul.mubr.msk.f32.gmra.mrb[8].mxu1 %vm191_vm14, %v1320_v32  ;;  %p1083_p3 = por %p1082_p2, %p1081_p1 }
  0x2b   :  { %334 = vmatprep.mubr.f32.mxu0 %v1100_v1  ;;  %382 = vmatprep.mubr.f32.mxu1 %v1100_v1 }
  0x2c   :  { %p1084_p4 = pnand %p1083_p3, %p1077_p0 }
  0x2e   :  { %970 = vmatmul.mubr.msk.f32.gmra.mrb[10].mxu0 %vm191_vm14, %v26_v33  ;;  %978 = vmatmul.mubr.msk.f32.gmra.mrb[10].mxu1 %vm191_vm14, %v1334_v34 }
  0x2f   :  { %340 = vmatprep.mubr.f32.mxu0 %v1100_v1  ;;  %388 = vmatprep.mubr.f32.mxu1 %v1100_v1 }
  0x32   :  { %971 = vmatmul.mubr.msk.f32.gmra.mrb[12].mxu0 %vm191_vm14, %v27_v35  ;;  %979 = vmatmul.mubr.msk.f32.gmra.mrb[12].mxu1 %vm191_vm14, %v1347_v36 }
  0x33   :  { %346 = vmatprep.mubr.f32.mxu0 %v1100_v1  ;;  %394 = vmatprep.mubr.f32.mxu1 %v1100_v1 }
  0x36   :  { %972 = vmatmul.mubr.msk.f32.gmra.mrb[14].mxu0 %vm191_vm14, %v28_v37  ;;  %980 = vmatmul.mubr.msk.f32.gmra.mrb[14].mxu1 %vm191_vm14, %v1360_v38 }
  0x37   :  { %675 = vmatprep.mubr.f32.mxu0 %v1100_v1  ;;  %465 = vmatprep.mubr.f32.mxu1 %v1100_v1 }
  0x3a   :  { %1015 = vmatmul.mubr.msk.f32.vlgmr.msra.gmra.mrb[16].mxu0 %vm562_vm4, %v37_v39  ;;  %997 = vmatmul.mubr.msk.f32.vlgmr.msra.gmra.mrb[16].mxu1 %vm191_vm14, %v1227_v22 }
  0x3b   :  { %681 = vmatprep.mubr.f32.mxu0 %v1100_v1  ;;  %471 = vmatprep.mubr.f32.mxu1 %v1100_v1 }
  0x3e   :  { %1016 = vmatmul.mubr.msk.f32.gmra.mrb[18].mxu0 %vm562_vm4, %v38_v40  ;;  %998 = vmatmul.mubr.msk.f32.gmra.mrb[18].mxu1 %vm191_vm14, %v1252_v25 }
  0x3f   :  { %687 = vmatprep.mubr.f32.mxu0 %v1100_v1  ;;  %477 = vmatprep.mubr.f32.mxu1 %v1100_v1 }
  0x42   :  { %1017 = vmatmul.mubr.msk.f32.gmra.mrb[20].mxu0 %vm562_vm4, %v39_v41  ;;  %999 = vmatmul.mubr.msk.f32.gmra.mrb[20].mxu1 %vm191_vm14, %v23_v27 }
  0x43   :  { %693 = vmatprep.mubr.f32.mxu0 %v1100_v1  ;;  %483 = vmatprep.mubr.f32.mxu1 %v1100_v1 }
  0x46   :  { %1018 = vmatmul.mubr.msk.f32.gmra.mrb[22].mxu0 %vm562_vm4, %v40_v42  ;;  %1000 = vmatmul.mubr.msk.f32.gmra.mrb[22].mxu1 %vm191_vm14, %v24_v29 }
  0x47   :  { %699 = vmatprep.mubr.f32.mxu0 %v1100_v1  ;;  %489 = vmatprep.mubr.f32.mxu1 %v1100_v1 }
  0x4a   :  { %1019 = vmatmul.mubr.msk.f32.gmra.mrb[24].mxu0 %vm562_vm4, %v41_v43  ;;  %1001 = vmatmul.mubr.msk.f32.gmra.mrb[24].mxu1 %vm191_vm14, %v25_v31 }
  0x4b   :  { %705 = vmatprep.mubr.f32.mxu0 %v1100_v1  ;;  %495 = vmatprep.mubr.f32.mxu1 %v1100_v1 }
  0x4e   :  { %1020 = vmatmul.mubr.msk.f32.gmra.mrb[26].mxu0 %vm562_vm4, %v42_v44  ;;  %1002 = vmatmul.mubr.msk.f32.gmra.mrb[26].mxu1 %vm191_vm14, %v26_v33 }
  0x4f   :  { %711 = vmatprep.mubr.f32.mxu0 %v1100_v1  ;;  %501 = vmatprep.mubr.f32.mxu1 %v1100_v1 }
  0x52   :  { %1021 = vmatmul.mubr.msk.f32.gmra.mrb[28].mxu0 %vm562_vm4, %v43_v45  ;;  %1003 = vmatmul.mubr.msk.f32.gmra.mrb[28].mxu1 %vm191_vm14, %v27_v35 }
  0x53   :  { %717 = vmatprep.mubr.f32.mxu0 %v1100_v1  ;;  %507 = vmatprep.mubr.f32.mxu1 %v1100_v1 }
  0x56   :  { %1022 = vmatmul.mubr.msk.f32.gmra.mrb[30].mxu0 %vm562_vm4, %v44_v46  ;;  %1004 = vmatmul.mubr.msk.f32.gmra.mrb[30].mxu1 %vm191_vm14, %v28_v37 }
  0x57   :  { %723 = vmatprep.mubr.f32.mxu0 %v1100_v1  ;;  %513 = vmatprep.mubr.f32.mxu1 %v1100_v1 }
  0x5a   :  { %1023 = vmatmul.mubr.msk.f32.gmra.mrb[32].mxu0 %vm562_vm4, %v45_v47  ;;  %1005 = vmatmul.mubr.msk.f32.gmra.mrb[32].mxu1 %vm191_vm14, %v1232_v23 }
  0x5b   :  { %729 = vmatprep.mubr.f32.mxu0 %v1100_v1  ;;  %519 = vmatprep.mubr.f32.mxu1 %v1100_v1 }
  0x5e   :  { %1024 = vmatmul.mubr.msk.f32.gmra.mrb[34].mxu0 %vm562_vm4, %v46_v48  ;;  %1006 = vmatmul.mubr.msk.f32.gmra.mrb[34].mxu1 %vm191_vm14, %v1257_v26 }
  0x5f   :  { %735 = vmatprep.mubr.f32.mxu0 %v1100_v1  ;;  %525 = vmatprep.mubr.f32.mxu1 %v1100_v1 }
  0x62   :  { %1025 = vmatmul.mubr.msk.f32.gmra.mrb[36].mxu0 %vm562_vm4, %v47_v49  ;;  %1007 = vmatmul.mubr.msk.f32.gmra.mrb[36].mxu1 %vm191_vm14, %v1282_v28 }
  0x63   :  { %741 = vmatprep.mubr.f32.mxu0 %v1100_v1  ;;  %531 = vmatprep.mubr.f32.mxu1 %v1100_v1 }
  0x66   :  { %1026 = vmatmul.mubr.msk.f32.gmra.mrb[38].mxu0 %vm562_vm4, %v48_v50  ;;  %1008 = vmatmul.mubr.msk.f32.gmra.mrb[38].mxu1 %vm191_vm14, %v1305_v30 }
  0x67   :  { %747 = vmatprep.mubr.f32.mxu0 %v1100_v1  ;;  %537 = vmatprep.mubr.f32.mxu1 %v1100_v1 }
  0x6a   :  { %1027 = vmatmul.mubr.msk.f32.gmra.mrb[40].mxu0 %vm562_vm4, %v49_v51  ;;  %1009 = vmatmul.mubr.msk.f32.gmra.mrb[40].mxu1 %vm191_vm14, %v1320_v32 }
  0x6b   :  { %753 = vmatprep.mubr.f32.mxu0 %v1100_v1  ;;  %543 = vmatprep.mubr.f32.mxu1 %v1100_v1 }
  0x6e   :  { %1028 = vmatmul.mubr.msk.f32.gmra.mrb[42].mxu0 %vm562_vm4, %v50_v52  ;;  %1010 = vmatmul.mubr.msk.f32.gmra.mrb[42].mxu1 %vm191_vm14, %v1334_v34 }
  0x6f   :  { %759 = vmatprep.mubr.f32.mxu0 %v1100_v1  ;;  %549 = vmatprep.mubr.f32.mxu1 %v1100_v1 }
  0x72   :  { %1029 = vmatmul.mubr.msk.f32.gmra.mrb[44].mxu0 %vm562_vm4, %v51_v53  ;;  %1011 = vmatmul.mubr.msk.f32.gmra.mrb[44].mxu1 %vm191_vm14, %v1347_v36 }
  0x73   :  { %765 = vmatprep.mubr.f32.mxu0 %v1100_v1  ;;  %555 = vmatprep.mubr.f32.mxu1 %v1100_v1 }
  0x76   :  { %1030 = vmatmul.mubr.msk.f32.gmra.mrb[46].mxu0 %vm562_vm4, %v52_v54  ;;  %1012 = vmatmul.mubr.msk.f32.gmra.mrb[46].mxu1 %vm191_vm14, %v1360_v38  ;;  %vm898_vm14 = vcmp.lt.s32.totalorder %v53_v0, 256 }
  0xed   :  { %v306_v55 = vpop.f32.mrb[0].mxu0  ;;  %v1487_v56 = vpop.f32.mrb[0].mxu1 }
  0xee   :  { %v308_v57 = vpop.f32.mrb[1].mxu0  ;;  %v1489_v58 = vpop.f32.mrb[1].mxu1 }
  0xf1   :  { %v312_v59 = vpop.f32.mrb[2].mxu0  ;;  %v1491_v60 = vpop.f32.mrb[2].mxu1 }
  0xf2   :  { %v314_v61 = vpop.f32.mrb[3].mxu0  ;;  %v1493_v62 = vpop.f32.mrb[3].mxu1 }
  0xf5   :  { %v318_v63 = vpop.f32.mrb[4].mxu0  ;;  %v1495_v3 = vpop.f32.mrb[4].mxu1 }
  0xf6   :  { %v320_v1 = vpop.f32.mrb[5].mxu0  ;;  %v1497_v4 = vpop.f32.mrb[5].mxu1 }
  0xf9   :  { %v324_v5 = vpop.f32.mrb[6].mxu0  ;;  %v1499_v6 = vpop.f32.mrb[6].mxu1 }
  0xfa   :  { %v326_v7 = vpop.f32.mrb[7].mxu0  ;;  %v1501_v8 = vpop.f32.mrb[7].mxu1 }
  0xfd   :  { %v330_v9 = vpop.f32.mrb[8].mxu0  ;;  %v1503_v10 = vpop.f32.mrb[8].mxu1 }
  0xfe   :  { %v332_v11 = vpop.f32.mrb[9].mxu0  ;;  %v1505_v12 = vpop.f32.mrb[9].mxu1 }
 0x101   :  { %v336_v13 = vpop.f32.mrb[10].mxu0  ;;  %v1507_v14 = vpop.f32.mrb[10].mxu1 }
 0x102   :  { %v1509_v15 = vpop.f32.mrb[11].mxu0  ;;  %v1511_v16 = vpop.f32.mrb[11].mxu1 }
 0x105   :  { %v1513_v17 = vpop.f32.mrb[12].mxu0  ;;  %v1515_v18 = vpop.f32.mrb[12].mxu1 }
 0x106   :  { %v1517_v19 = vpop.f32.mrb[13].mxu0  ;;  %v1519_v20 = vpop.f32.mrb[13].mxu1 }
 0x109   :  { %v1521_v21 = vpop.f32.mrb[14].mxu0  ;;  %v1523_v22 = vpop.f32.mrb[14].mxu1 }
 0x10a   :  { %v1525_v23 = vpop.f32.mrb[15].mxu0  ;;  %v1527_v24 = vpop.f32.mrb[15].mxu1 }
 0x10d   :  { %v677_v25 = vpop.f32.mrb[16].mxu0  ;;  %v467_v26 = vpop.f32.mrb[16].mxu1 }
 0x10e   :  { %v772_v27 = vmul.f32 %v677_v25, %v306_v55  ;;  %v679_v28 = vpop.f32.mrb[17].mxu0  ;;  %v469_v29 = vpop.f32.mrb[17].mxu1 }
 0x10f   :  { %v773_v30 = vmul.f32 %v679_v28, %v308_v57 }
 0x110   :  { %v804_v31 = vmul.f32 %v772_v27, %v467_v26 }
 0x111   :  { %v805_v32 = vmul.f32 %v773_v30, %v469_v29  ;;  %v683_v33 = vpop.f32.mrb[18].mxu0  ;;  %v473_v34 = vpop.f32.mrb[18].mxu1 }
 0x112   :  { %v774_v35 = vmul.f32 %v683_v33, %v312_v59  ;;  %v685_v36 = vpop.f32.mrb[19].mxu0  ;;  %v475_v37 = vpop.f32.mrb[19].mxu1 }
 0x113   :  { %v775_v38 = vmul.f32 %v685_v36, %v314_v61 }
 0x114   :  { %v806_v39 = vmul.f32 %v774_v35, %v473_v34 }
 0x115   :  { %v807_v40 = vmul.f32 %v775_v38, %v475_v37  ;;  %v689_v41 = vpop.f32.mrb[20].mxu0  ;;  %v479_v42 = vpop.f32.mrb[20].mxu1 }
 0x116   :  { %v836_v43 = vadd.f32 %v806_v39, %v804_v31  ;;  %v776_v44 = vmul.f32 %v689_v41, %v318_v63  ;;  %v691_v45 = vpop.f32.mrb[21].mxu0  ;;  %v481_v46 = vpop.f32.mrb[21].mxu1 }
 0x117   :  { %v857_v47 = vadd.f32 %v807_v40, %v805_v32  ;;  %v777_v48 = vmul.f32 %v691_v45, %v320_v1 }
 0x118   :  { %v808_v49 = vmul.f32 %v776_v44, %v479_v42 }
 0x119   :  { %v809_v50 = vmul.f32 %v777_v48, %v481_v46  ;;  %v695_v51 = vpop.f32.mrb[22].mxu0  ;;  %v485_v52 = vpop.f32.mrb[22].mxu1 }
 0x11a   :  { %v837_v53 = vadd.f32 %v836_v43, %v808_v49  ;;  %v778_v54 = vmul.f32 %v695_v51, %v324_v5  ;;  %v697_v55 = vpop.f32.mrb[23].mxu0  ;;  %v487_v57 = vpop.f32.mrb[23].mxu1 }
 0x11b   :  { %v858_v59 = vadd.f32 %v857_v47, %v809_v50  ;;  %v779_v61 = vmul.f32 %v697_v55, %v326_v7 }
 0x11c   :  { %v810_v25 = vmul.f32 %v778_v54, %v485_v52 }
 0x11d   :  { %v811_v26 = vmul.f32 %v779_v61, %v487_v57  ;;  %v701_v27 = vpop.f32.mrb[24].mxu0  ;;  %v491_v28 = vpop.f32.mrb[24].mxu1 }
 0x11e   :  { %v838_v29 = vadd.f32 %v837_v53, %v810_v25  ;;  %v780_v63 = vmul.f32 %v701_v27, %v330_v9  ;;  %v703_v30 = vpop.f32.mrb[25].mxu0  ;;  %v493_v31 = vpop.f32.mrb[25].mxu1 }
 0x11f   :  { %v859_v32 = vadd.f32 %v858_v59, %v811_v26  ;;  %v781_v1 = vmul.f32 %v703_v30, %v332_v11 }
 0x120   :  { %v812_v33 = vmul.f32 %v780_v63, %v491_v28 }
 0x121   :  { %v813_v34 = vmul.f32 %v781_v1, %v493_v31  ;;  %v707_v35 = vpop.f32.mrb[26].mxu0  ;;  %v497_v36 = vpop.f32.mrb[26].mxu1 }
 0x122   :  { %v839_v37 = vadd.f32 %v838_v29, %v812_v33  ;;  %v782_v5 = vmul.f32 %v707_v35, %v336_v13  ;;  %v709_v38 = vpop.f32.mrb[27].mxu0  ;;  %v499_v39 = vpop.f32.mrb[27].mxu1 }
 0x123   :  { %v860_v40 = vadd.f32 %v859_v32, %v813_v34  ;;  %v783_v7 = vmul.f32 %v709_v38, %v1509_v15 }
 0x124   :  { %v814_v41 = vmul.f32 %v782_v5, %v497_v36 }
 0x125   :  { %v815_v42 = vmul.f32 %v783_v7, %v499_v39  ;;  %v713_v43 = vpop.f32.mrb[28].mxu0  ;;  %v503_v44 = vpop.f32.mrb[28].mxu1 }
 0x126   :  { %v840_v9 = vadd.f32 %v839_v37, %v814_v41  ;;  %v784_v45 = vmul.f32 %v713_v43, %v1513_v17  ;;  %v715_v46 = vpop.f32.mrb[29].mxu0  ;;  %v505_v11 = vpop.f32.mrb[29].mxu1 }
 0x127   :  { %v861_v47 = vadd.f32 %v860_v40, %v815_v42  ;;  %v785_v48 = vmul.f32 %v715_v46, %v1517_v19 }
 0x128   :  { %v816_v49 = vmul.f32 %v784_v45, %v503_v44 }
 0x129   :  { %v817_v50 = vmul.f32 %v785_v48, %v505_v11  ;;  %v719_v13 = vpop.f32.mrb[30].mxu0  ;;  %v509_v51 = vpop.f32.mrb[30].mxu1 }
 0x12a   :  { %v841_v52 = vadd.f32 %v840_v9, %v816_v49  ;;  %v786_v53 = vmul.f32 %v719_v13, %v1521_v21  ;;  %v721_v15 = vpop.f32.mrb[31].mxu0  ;;  %v511_v54 = vpop.f32.mrb[31].mxu1 }
 0x12b   :  { %v862_v55 = vadd.f32 %v861_v47, %v817_v50  ;;  %v787_v57 = vmul.f32 %v721_v15, %v1525_v23 }
 0x12c   :  { %v818_v59 = vmul.f32 %v786_v53, %v509_v51 }
 0x12d   :  { %v819_v61 = vmul.f32 %v787_v57, %v511_v54  ;;  %v725_v17 = vpop.f32.mrb[32].mxu0  ;;  %v515_v25 = vpop.f32.mrb[32].mxu1 }
 0x12e   :  { %v842_v26 = vadd.f32 %v841_v52, %v818_v59  ;;  %v788_v27 = vmul.f32 %v725_v17, %v1487_v56  ;;  %v727_v19 = vpop.f32.mrb[33].mxu0  ;;  %v517_v28 = vpop.f32.mrb[33].mxu1 }
 0x12f   :  { %v863_v29 = vadd.f32 %v862_v55, %v819_v61  ;;  %v789_v63 = vmul.f32 %v727_v19, %v1489_v58 }
 0x130   :  { %v820_v30 = vmul.f32 %v788_v27, %v515_v25 }
 0x131   :  { %v821_v31 = vmul.f32 %v789_v63, %v517_v28  ;;  %v731_v21 = vpop.f32.mrb[34].mxu0  ;;  %v521_v32 = vpop.f32.mrb[34].mxu1 }
 0x132   :  { %v843_v1 = vadd.f32 %v842_v26, %v820_v30  ;;  %v790_v33 = vmul.f32 %v731_v21, %v1491_v60  ;;  %v733_v23 = vpop.f32.mrb[35].mxu0  ;;  %v523_v34 = vpop.f32.mrb[35].mxu1 }
 0x133   :  { %v864_v35 = vadd.f32 %v863_v29, %v821_v31  ;;  %v791_v36 = vmul.f32 %v733_v23, %v1493_v62 }
 0x134   :  { %v822_v37 = vmul.f32 %v790_v33, %v521_v32 }
 0x135   :  { %v823_v5 = vmul.f32 %v791_v36, %v523_v34  ;;  %v737_v56 = vpop.f32.mrb[36].mxu0  ;;  %v527_v38 = vpop.f32.mrb[36].mxu1 }
 0x136   :  { %v844_v39 = vadd.f32 %v843_v1, %v822_v37  ;;  %v792_v40 = vmul.f32 %v737_v56, %v1495_v3  ;;  %v739_v58 = vpop.f32.mrb[37].mxu0  ;;  %v529_v7 = vpop.f32.mrb[37].mxu1 }
 0x137   :  { %v865_v41 = vadd.f32 %v864_v35, %v823_v5  ;;  %v793_v42 = vmul.f32 %v739_v58, %v1497_v4 }
 0x138   :  { %v824_v43 = vmul.f32 %v792_v40, %v527_v38 }
 0x139   :  { %v825_v44 = vmul.f32 %v793_v42, %v529_v7  ;;  %v743_v60 = vpop.f32.mrb[38].mxu0  ;;  %v533_v9 = vpop.f32.mrb[38].mxu1 }
 0x13a   :  { %v845_v45 = vadd.f32 %v844_v39, %v824_v43  ;;  %v794_v46 = vmul.f32 %v743_v60, %v1499_v6  ;;  %v745_v62 = vpop.f32.mrb[39].mxu0  ;;  %v535_v11 = vpop.f32.mrb[39].mxu1 }
 0x13b   :  { %v866_v47 = vadd.f32 %v865_v41, %v825_v44  ;;  %v795_v48 = vmul.f32 %v745_v62, %v1501_v8  ;;  %v1103_v41 = vmov 1966171168  }
 0x13c   :  { %v826_v49 = vmul.f32 %v794_v46, %v533_v9  ;;  %v882_v42 = vunpack.c.l.s4 %v1103_v41 }
 0x13d   :  { %v827_v50 = vmul.f32 %v795_v48, %v535_v11  ;;  %v749_v3 = vpop.f32.mrb[40].mxu0  ;;  %v539_v13 = vpop.f32.mrb[40].mxu1 }
 0x13e   :  { %v846_v51 = vadd.f32 %v845_v45, %v826_v49  ;;  %v796_v52 = vmul.f32 %v749_v3, %v1503_v10  ;;  %v751_v4 = vpop.f32.mrb[41].mxu0  ;;  %v541_v53 = vpop.f32.mrb[41].mxu1 }
 0x13f   :  { %v867_v15 = vadd.f32 %v866_v47, %v827_v50  ;;  %v797_v54 = vmul.f32 %v751_v4, %v1505_v12 }
 0x140   :  { %v828_v55 = vmul.f32 %v796_v52, %v539_v13 }
 0x141   :  { %v829_v57 = vmul.f32 %v797_v54, %v541_v53  ;;  %v755_v6 = vpop.f32.mrb[42].mxu0  ;;  %v545_v59 = vpop.f32.mrb[42].mxu1 }
 0x142   :  { %v847_v61 = vadd.f32 %v846_v51, %v828_v55  ;;  %v798_v17 = vmul.f32 %v755_v6, %v1507_v14  ;;  %v757_v8 = vpop.f32.mrb[43].mxu0  ;;  %v547_v25 = vpop.f32.mrb[43].mxu1 }
 0x143   :  { %v868_v26 = vadd.f32 %v867_v15, %v829_v57  ;;  %v799_v27 = vmul.f32 %v757_v8, %v1511_v16 }
 0x144   :  { %v830_v19 = vmul.f32 %v798_v17, %v545_v59 }
 0x145   :  { %v831_v28 = vmul.f32 %v799_v27, %v547_v25  ;;  %v761_v10 = vpop.f32.mrb[44].mxu0  ;;  %v551_v29 = vpop.f32.mrb[44].mxu1 }
 0x146   :  { %v848_v63 = vadd.f32 %v847_v61, %v830_v19  ;;  %v800_v30 = vmul.f32 %v761_v10, %v1515_v18  ;;  %v763_v12 = vpop.f32.mrb[45].mxu0  ;;  %v553_v31 = vpop.f32.mrb[45].mxu1 }
 0x147   :  { %v869_v21 = vadd.f32 %v868_v26, %v831_v28  ;;  %v801_v32 = vmul.f32 %v763_v12, %v1519_v20 }
 0x148   :  { %v832_v1 = vmul.f32 %v800_v30, %v551_v29 }
 0x149   :  { %v833_v33 = vmul.f32 %v801_v32, %v553_v31  ;;  %v767_v14 = vpop.f32.mrb[46].mxu0  ;;  %v557_v23 = vpop.f32.mrb[46].mxu1 }
 0x14a   :  { %v849_v34 = vadd.f32 %v848_v63, %v832_v1  ;;  %v802_v35 = vmul.f32 %v767_v14, %v1523_v22  ;;  %v769_v16 = vpop.f32.mrb[47].mxu0  ;;  %v559_v36 = vpop.f32.mrb[47].mxu1  ;;  %v883_v22 = vunpack.c.0.s8 %v882_v42 }
 0x14b   :  { %v870_v37 = vadd.f32 %v869_v21, %v833_v33  ;;  %v803_v5 = vmul.f32 %v769_v16, %v1527_v24 }
 0x14c   :  { %v834_v56 = vmul.f32 %v802_v35, %v557_v23  ;;  %v886_v24 = vsub.s32 %v883_v22, %v1138_v2 }
 0x14d   :  { %v835_v38 = vmul.f32 %v803_v5, %v559_v36 }
 0x14e   :  { %v850_v18 = vadd.f32 %v849_v34, %v834_v56 }
 0x14f   :  { %v871_v39 = vadd.f32 %v870_v37, %v835_v38 }
 0x150   :  { %v851_v40 = vrot.slane %v850_v18, 4 }
 0x151   :  { %v872_v58 = vrot.slane %v871_v39, 4 }
 0x152   :  { %v852_v7 = vadd.f32 %v851_v40, %v850_v18 }
 0x153   :  { %v873_v20 = vadd.f32 %v872_v58, %v871_v39 }
 0x154   :  { %v853_v43 = vrot.slane %v852_v7, 2 }
 0x155   :  { %v874_v44 = vrot.slane %v873_v20, 2 }
 0x156   :  { %v854_v60 = vadd.f32 %v853_v43, %v852_v7 }
 0x157   :  { %v875_v9 = vadd.f32 %v874_v44, %v873_v20 }
 0x158   :  { %v855_v45 = vrot.slane %v854_v60, 1 }
 0x159   :  { %v876_v46 = vrot.slane %v875_v9, 1 }
 0x15a   :  { %v856_v62 = vadd.f32 %v855_v45, %v854_v60 }
 0x15b   :  { %v877_v11 = vadd.f32 %v876_v46, %v875_v9 }
 0x15d   :  { %v880_v47 = vcombine.low %v856_v62, %v877_v11 }
 0x15f   :  { %v887_v48 = vrot.slane %v880_v47, %v886_v24 }
 0x161   :  { %v894_v49 = vrot.slane %v887_v48, %v886_v24 }
 0x163   :  { %900 = vst.msk [vmem:[#allocation2] sm:$0x3] %vm898_vm14, %v894_v49 }
 0x164   :  { %1087 = shalt.err (!%p1084_p4)
}
 0x165   :  { %s1088_s6 = scalar_lea.hbm %s1569_s5, 32 }
 0x166   :  { %p1089_p5 = scmp.ne.s32.totalorder %s1569_s5, %s1088_s6  ;;  %p1092_p6 = scmp.lt.u32.totalorder %s1088_s6, %s1569_s5 }
 0x168   :  { %p1094_p7 = pnand %p1092_p6, %p1089_p5 }
 0x16a   :  { %1097 = shalt.err (!%p1094_p7)
}
 0x16b   :  { %910 = dma.vmem_to_hbm [thread:$0]  %s908_s27, 32, %s1569_s5, [#allocation3]  }
 0x16c   :  { %1098 = dma.done.wait [#allocation3], 32  }
 0x16d   :  { %1099 = vsyncadd [#allocation3], 4294967264 }
 0x16e   :  { %914 = vsyncpa [#allocation3], 1 }

</bundles_post_ra>
